<compile_context>
chip_gen: v5e
topology: v5e:2x2
jax: 0.10.0
libtpu: 0.0.40
codegen_flags: <defaults>
</compile_context>

<pallas_src>
import functools

import jax
import jax.numpy as jnp
from jax.experimental import pallas as pl
from jax.experimental.pallas import tpu as pltpu


def _round_up(a: int, b: int) -> int:
    return ((a + b - 1) // b) * b


def _largest_dividing_tile(cap: int, n_pad: int) -> int:
    """Largest multiple of 128 that divides n_pad and is <= cap."""
    t = 128  # n_pad is always a multiple of 128, so 128 always divides.
    c = 256
    while c <= cap:
        if n_pad % c == 0:
            t = c
        c += 128
    return t


def _pick_tile_and_vmem(n_pad: int):
    """Chip-aware tile / VMEM-limit selection (plain Python at trace time)."""
    kind = ""
    try:
        kind = jax.devices()[0].device_kind.lower()
    except Exception:  # defensive; never expected on a TPU backend
        pass

    if "v7" in kind:
        # 64 MiB VMEM per TensorCore: modest tiles, leave headroom.
        cap, vmem, want_split = 768, 48 * 1024 * 1024, True
    elif "v5 lite" in kind or "v5e" in kind or "v5litepod" in kind:
        # Already compute-bound at 512 for f32; bigger tiles only add VMEM
        # pressure.  Explicit 32 MiB raise is load-bearing (scoped default 16).
        cap, vmem, want_split = 512, 32 * 1024 * 1024, False
    else:
        # v6e (and default): 128 MiB physical VMEM, HBM-bound at 512 -> 1024.
        cap, vmem, want_split = 1024, 96 * 1024 * 1024, False

    cap = min(cap, n_pad)
    if want_split and n_pad >= 256:
        # Keep the product of the two "parallel" grid axes >= 2 so the second
        # TensorCore on v7x gets work (megacore sharding).
        cap = min(cap, max(128, n_pad // 2))

    return _largest_dividing_tile(cap, n_pad), vmem


def _model_kernel(a_ref, b_ref, t1_ref, t2_ref, acc_ref):
    """One (i, j, k) step of the tiled x @ x.

    Outputs (both dense (t, t) blocks):
      t1_ref : x @ x
      t2_ref : (x @ x) * (x @ x)
    The third torch.cat slab (t3 = x @ x) is bit-identical to t1 and is
    assembled in the wrapper.
    """
    k = pl.program_id(2)

    @pl.when(k == 0)
    def _():
        acc_ref[...] = jnp.zeros_like(acc_ref)

    # Single MXU matmul per grid step, f32 accumulation.
    acc_ref[...] += jnp.dot(a_ref[...], b_ref[...],
                            preferred_element_type=jnp.float32)

    @pl.when(k == pl.num_programs(2) - 1)
    def _():
        t1 = acc_ref[...].astype(t1_ref.dtype)
        t1_ref[...] = t1
        t2_ref[...] = t1 * t1   # VPU elementwise; free under the MXU


@functools.partial(jax.jit, static_argnames=("tile",))
def model_forward(x, *, tile=None):
    n, m = x.shape
    assert n == m, "torch.mm(x, x) requires a square input"
    dtype = x.dtype

    # Pad N to a multiple of 128 (lane width), NOT to the tile size.
    n_pad = _round_up(n, 128)

    if tile is None:
        t, vmem_limit = _pick_tile_and_vmem(n_pad)
    else:
        t = _largest_dividing_tile(min(_round_up(tile, 128), n_pad), n_pad)
        vmem_limit = 64 * 1024 * 1024

    if n_pad != n:
        # Zero-pad: the top-left (n, n) block of x_pad @ x_pad equals x @ x.
        x_p = jnp.pad(x, ((0, n_pad - n), (0, n_pad - n)))
    else:
        x_p = x

    g = n_pad // t
    grid = (g, g, g)

    itemsize = jnp.dtype(dtype).itemsize
    cost = pl.CostEstimate(
        flops=2 * n_pad * n_pad * n_pad + n_pad * n_pad,
        transcendentals=0,
        # LHS re-streamed once per j, RHS once per i (g-fold each); two dense
        # (n_pad, n_pad) outputs written once.
        bytes_accessed=(2 * g * n_pad * n_pad + 2 * n_pad * n_pad) * itemsize,
    )

    t1_p, t2_p = pl.pallas_call(
        _model_kernel,
        out_shape=(
            jax.ShapeDtypeStruct((n_pad, n_pad), dtype),   # t1 = x @ x
            jax.ShapeDtypeStruct((n_pad, n_pad), dtype),   # t2 = t1 * t1
        ),
        grid_spec=pltpu.PrefetchScalarGridSpec(
            num_scalar_prefetch=0,
            grid=grid,
            in_specs=[
                pl.BlockSpec((t, t), lambda i, j, k: (i, k)),   # x as LHS
                pl.BlockSpec((t, t), lambda i, j, k: (k, j)),   # x as RHS
            ],
            out_specs=(
                pl.BlockSpec((t, t), lambda i, j, k: (i, j)),   # t1
                pl.BlockSpec((t, t), lambda i, j, k: (i, j)),   # t2
            ),
            scratch_shapes=[pltpu.VMEM((t, t), jnp.float32)],
        ),
        compiler_params=pltpu.CompilerParams(
            dimension_semantics=("parallel", "parallel", "arbitrary"),
            vmem_limit_bytes=vmem_limit,
        ),
        cost_estimate=cost,
    )(x_p, x_p)

    t1 = t1_p[:n, :n]
    t2 = t2_p[:n, :n]
    # torch.cat([t1, t2, t3], dim=1) with t3 == t1 (O(N^2) wrapper copy).
    return jnp.concatenate([t1, t2, t1], axis=1)


def _reference(x):
    t1 = jnp.dot(x, x, precision=jax.lax.Precision.HIGHEST)
    t2 = t1 * t1
    t3 = t1
    return jnp.concatenate([t1, t2, t3], axis=1)


if __name__ == "__main__":
    key = jax.random.PRNGKey(0)
    k1, k2 = jax.random.split(key)

    # Case 1: tile override 128 on N=256 -> full 2x2x2 grid, exercises the
    # accumulator init/finalize and both dense output writes.
    n1 = 256
    x1 = jax.random.normal(k1, (n1, n1), dtype=jnp.float32)
    out1 = model_forward(x1, tile=128)
    jax.block_until_ready(out1)
    ref1 = _reference(x1)
    assert out1.shape == (n1, 3 * n1), out1.shape
    assert jnp.allclose(out1, ref1, rtol=1e-3, atol=1e-2), "mismatch (tiled case)"

    # Case 2: N not a multiple of 128 -> 128-padding path + chip-aware tile.
    n2 = 200
    x2 = jax.random.normal(k2, (n2, n2), dtype=jnp.float32)
    out2 = model_forward(x2)
    jax.block_until_ready(out2)
    ref2 = _reference(x2)
    assert out2.shape == (n2, 3 * n2), out2.shape
    assert jnp.allclose(out2, ref2, rtol=1e-3, atol=1e-2), "mismatch (padded case)"

    print("KERNEL_OK")
</pallas_src>

<mosaic_0001>
module attributes {stable_mosaic.version = 11 : i64} {
  func.func @_model_kernel(%arg0: i32, %arg1: i32, %arg2: i32, %arg3: memref<128x128xf32, #tpu.memory_space<vmem>>, %arg4: memref<128x128xf32, #tpu.memory_space<vmem>>, %arg5: memref<128x128xf32, #tpu.memory_space<vmem>>, %arg6: memref<128x128xf32, #tpu.memory_space<vmem>>, %arg7: memref<128x128xf32, #tpu.memory_space<vmem>>) attributes {dimension_semantics = [#tpu.dimension_semantics<parallel>, #tpu.dimension_semantics<parallel>, #tpu.dimension_semantics<arbitrary>], iteration_bounds = array<i64: 2, 2, 2>, scalar_prefetch = 0 : i64, scratch_operands = 1 : i64, tpu.core_type = #tpu.core_type<tc>, window_params = [{transform_indices = @transform_0, window_bounds = array<i64: 128, 128>}, {transform_indices = @transform_1, window_bounds = array<i64: 128, 128>}, {transform_indices = @transform_2, window_bounds = array<i64: 128, 128>}, {transform_indices = @transform_3, window_bounds = array<i64: 128, 128>}]} {
    %c0_i32 = arith.constant 0 : i32
    %0 = arith.cmpi eq, %arg2, %c0_i32 : i32
    %1 = arith.extui %0 : i1 to i32
    %c0_i32_0 = arith.constant 0 : i32
    %2 = arith.cmpi ne, %1, %c0_i32_0 : i32
    scf.if %2 {
      %cst_9 = arith.constant 0.000000e+00 : f32
      %12 = vector.broadcast %cst_9 : f32 to vector<128x128xf32>
      %c0_10 = arith.constant 0 : index
      %c0_11 = arith.constant 0 : index
      %13 = vector.load %arg7[%c0_10, %c0_11] : memref<128x128xf32, #tpu.memory_space<vmem>>, vector<128x128xf32>
      tpu.vector_store %arg7[%c0_10, %c0_11], %12 {strides = array<i32>} : memref<128x128xf32, #tpu.memory_space<vmem>>, vector<128x128xf32>,
    } else {
    }
    %c0 = arith.constant 0 : index
    %c0_1 = arith.constant 0 : index
    %3 = vector.load %arg7[%c0, %c0_1] : memref<128x128xf32, #tpu.memory_space<vmem>>, vector<128x128xf32>
    %c0_2 = arith.constant 0 : index
    %c0_3 = arith.constant 0 : index
    %4 = vector.load %arg3[%c0_2, %c0_3] : memref<128x128xf32, #tpu.memory_space<vmem>>, vector<128x128xf32>
    %c0_4 = arith.constant 0 : index
    %c0_5 = arith.constant 0 : index
    %5 = vector.load %arg4[%c0_4, %c0_5] : memref<128x128xf32, #tpu.memory_space<vmem>>, vector<128x128xf32>
    %cst = arith.constant dense<0.000000e+00> : vector<128x128xf32>
    %6 = tpu.matmul %4, %5, %cst {dimension_numbers = #tpu.dot_dimension_numbers<[1], [0], [0], [1], [0, 0, 1, 1], [], []>} : vector<128x128xf32>, vector<128x128xf32>, vector<128x128xf32> -> vector<128x128xf32>
    %7 = arith.addf %3, %6 : vector<128x128xf32>
    %c0_6 = arith.constant 0 : index
    %c0_7 = arith.constant 0 : index
    %8 = vector.load %arg7[%c0_6, %c0_7] : memref<128x128xf32, #tpu.memory_space<vmem>>, vector<128x128xf32>
    tpu.vector_store %arg7[%c0_6, %c0_7], %7 {strides = array<i32>} : memref<128x128xf32, #tpu.memory_space<vmem>>, vector<128x128xf32>,
    %c1_i32 = arith.constant 1 : i32
    %9 = arith.cmpi eq, %arg2, %c1_i32 : i32
    %10 = arith.extui %9 : i1 to i32
    %c0_i32_8 = arith.constant 0 : i32
    %11 = arith.cmpi ne, %10, %c0_i32_8 : i32
    scf.if %11 {
      %c0_9 = arith.constant 0 : index
      %c0_10 = arith.constant 0 : index
      %12 = vector.load %arg7[%c0_9, %c0_10] : memref<128x128xf32, #tpu.memory_space<vmem>>, vector<128x128xf32>
      %c0_11 = arith.constant 0 : index
      %c0_12 = arith.constant 0 : index
      %13 = vector.load %arg5[%c0_11, %c0_12] : memref<128x128xf32, #tpu.memory_space<vmem>>, vector<128x128xf32>
      tpu.vector_store %arg5[%c0_11, %c0_12], %12 {strides = array<i32>} : memref<128x128xf32, #tpu.memory_space<vmem>>, vector<128x128xf32>,
      %14 = arith.mulf %12, %12 : vector<128x128xf32>
      %c0_13 = arith.constant 0 : index
      %c0_14 = arith.constant 0 : index
      %15 = vector.load %arg6[%c0_13, %c0_14] : memref<128x128xf32, #tpu.memory_space<vmem>>, vector<128x128xf32>
      tpu.vector_store %arg6[%c0_13, %c0_14], %14 {strides = array<i32>} : memref<128x128xf32, #tpu.memory_space<vmem>>, vector<128x128xf32>,
    } else {
    }
    return
  }
  func.func @transform_0(%arg0: i32, %arg1: i32, %arg2: i32) -> (i32, i32) {
    %c0_i32 = arith.constant 0 : i32
    return %arg0, %arg2 : i32, i32
  }
  func.func @transform_1(%arg0: i32, %arg1: i32, %arg2: i32) -> (i32, i32) {
    %c0_i32 = arith.constant 0 : i32
    return %arg2, %arg1 : i32, i32
  }
  func.func @transform_2(%arg0: i32, %arg1: i32, %arg2: i32) -> (i32, i32) {
    %c0_i32 = arith.constant 0 : i32
    return %arg0, %arg1 : i32, i32
  }
  func.func @transform_3(%arg0: i32, %arg1: i32, %arg2: i32) -> (i32, i32) {
    %c0_i32 = arith.constant 0 : i32
    return %arg0, %arg1 : i32, i32
  }
}

</mosaic_0001>

<bundles_post_ra>
// kernel: model_forward.1
= control target key start
LH: loop header
LB: loop body
LE: loop exit
PB: predicated region body
PF: predicated region fallthrough
CT: control target
= control target key end

     0   :  { %s1665_s0 = inlined_call_operand.hbm [shape: f32[256,256], index: 0, kind: input, shape index: {}, may-alias: {0,1}]   ;;  %s1666_s1 = inlined_call_operand.hbm [shape: f32[256,256], index: 1, kind: input, shape index: {}, may-alias: {0,1}]   ;;  %s1667_s2 = inlined_call_operand.vmem [shape: f32[256,256], index: 2, kind: output, shape index: {0}]   ;;  %s1668_s3 = inlined_call_operand.vmem [shape: f32[256,256], index: 3, kind: output, shape index: {1}]  }
   0x1   :  { %1678 = sst [smem:[#allocation21_spill]] %s1665_s0 }
   0x2   :  { %1679 = sst [smem:[#allocation22_spill]] %s1667_s2 }
   0x3   :  { %1680 = sst [smem:[#allocation23_spill]] %s1668_s3 }
   0x4   :  { %9 = vsyncpa [#allocation4], 0 }
   0x5   :  { %11 = vsyncpa [#allocation4 + $0x1], 0 }
   0x6   :  { %12 = vsyncpa [#allocation6], 0 }
   0x7   :  { %14 = vsyncpa [#allocation6 + $0x1], 0  ;;  %s1281_s12 = smov 0   ;;  %s1283_s13 = smov 0  }
   0x8   :  { %s1285_s14 = smov 0   ;;  %s1287_s15 = smov 0  }
   0x9   :  { %s1289_s16 = smov 0   ;;  %s1291_s17 = smov 0  }
   0xa   :  { %s1293_s18 = smov 0   ;;  %s1295_s19 = smov 0  }
   0xb   :  { %s1297_s20 = smov 0   ;;  %s1299_s21 = smov 0  }
   0xc   :  { %s1301_s22 = smov 0   ;;  %s1303_s23 = smov 0  }
   0xd   :  { %s1305_s24 = smov 0   ;;  %s1307_s25 = smov 0  }
   0xe   :  { %s1309_s26 = smov 0  }
   0xf LB: > { %1681 = sst [smem:[#allocation11_spill]] %s1199_s12  ;;  %s852_s27 = sadd.s32 4294967295, %s1255_s26   ;;  %s1255_s26 = sphi %s1309_s26, %s20_s26   ;;  %s1251_s25 = sphi %s1307_s25, %s1722_s25   ;;  %s1247_s24 = sphi %s1305_s24, %s1734_s24   ;;  %s1243_s23 = sphi %s1303_s23, %s1733_s23   ;;  %s1239_s22 = sphi %s1301_s22, %s1719_s22   ;;  %s1235_s21 = sphi %s1299_s21, %s1732_s21   ;;  %s1231_s20 = sphi %s1297_s20, %s1731_s20   ;;  %s1227_s19 = sphi %s1295_s19, %s1730_s19   ;;  %s1223_s18 = sphi %s1293_s18, %s1729_s18   ;;  %s1219_s17 = sphi %s1291_s17, %s1728_s17   ;;  %s1215_s16 = sphi %s1289_s16, %s1727_s16   ;;  %s1211_s15 = sphi %s1287_s15, %s1726_s15   ;;  %s1207_s14 = sphi %s1285_s14, %s1725_s14   ;;  %s1203_s13 = sphi %s1283_s13, %s1724_s13   ;;  %s1199_s12 = sphi %s1281_s12, %s1723_s12  }
  0x10   : > { %1682 = sst [smem:[#allocation12_spill]] %s1231_s20  ;;  %s32_s28 = sadd.s32 1, %s1243_s23 }
  0x11   : > { %1683 = sst [smem:[#allocation13_spill]] %s1235_s21  ;;  %p1356_p0 = scmp.ge.s32.totalorder %s32_s28, 2 }
  0x12   : > { %1684 = sst [smem:[#allocation14_spill]] %s1239_s22  ;;  %p55_p1 = scmp.ne.s32.totalorder %s1227_s19, %s1223_s18 }
  0x13   : > { %1685 = sst [smem:[#allocation15_spill]] %s1251_s25  ;;  %s1736_s28 = smov (%p1356_p0, %s32_s28), 0 }
  0x14   : > { %1687 = sst [smem:[#allocation16_spill]] %s1736_s28  ;;  %p56_p2 = scmp.eq.s32.totalorder %s1255_s26, 0 }
  0x15   : > { %p61_p3 = scmp.ne.s32.totalorder %s1223_s18, %s1219_s17  ;;  %s1372_s5 = ssub.s32 %s1243_s23, %s1736_s28 }
  0x16   : > { %p1374_p4 = scmp.eq.s32.totalorder %s852_s27, 0  ;;  %p1380_p5 = por %p56_p2, %p55_p1 }
  0x17   : > { %p1384_p6 = scmp.eq.s32.totalorder %s852_s27, 7  ;;  %p944_p8 = scmp.lt.s32.totalorder %s1255_s26, 8 }
  0x18   : > { %p1390_p7 = por %p1374_p4, %p61_p3  ;;  %s169_s10 = sand.u32 1, %s1227_s19  }
  0x19   : > { %s856_s11 = sshll.u32 %s169_s10, 7  ;;  %s881_s17 = sshll.u32 %s1251_s25, 5 }
  0x1a   : > { %s178_s4 = sadd.s32 %s1243_s23, %s881_s17  ;;  %s173_s30 = scalar_lea.vmem [#allocation3], %s856_s11 }
  0x1b   : > { %s183_s28 = sshll.u32 %s173_s30, 4  ;;  %s859_s27 = sshll.u32 %s178_s4, 3  ;;  %s184_s28 = int_to_ptr.vmem [resolvable:$true] %s183_s28 }
  0x1c   : > { %s1692_s0 = sld [smem:[#allocation21_spill]]  ;;  %p938_p9 = pnand %p944_p8, %p1380_p5 }
  0x1d   : > { %s170_s30 = scalar_lea.sflag [#allocation4], %s169_s10  ;;  %s1670_s11 = smov 256  }
  0x1e   : > { %s1671_s4 = smov 128   ;;  %s1672_s22 = smov 8  }
  0x1f   : > { %p864_p10 = scmp.ge.s32.totalorder %s1255_s26, 1  ;;  %p215_p11 = scmp.lt.s32.totalorder %s1255_s26, 9 }
  0x20   : > { %s35_s3 = sadd.s32 1, %s1247_s24  ;;  %p83_p13 = scmp.ne.s32.totalorder %s1215_s16, %s1211_s15 }
  0x21   : > { %p1410_p12 = pnand %p864_p10, %p215_p11  ;;  %s1738_s3 = smov (!%p1356_p0, %s35_s3), %s1247_s24 }
  0x22   : > { %s180_s21 = scalar_lea.hbm %s1692_s0, %s859_s27  ;;  %p37_p1 = scmp.ge.s32.totalorder %s1738_s3, 2 }
  0x23   : > { %s181_s17 = sshll.u32 %s180_s21, 4  ;;  %s76_s21 = sadd.s32 1, %s1215_s16  ;;  %s182_s17 = int_to_ptr.hbm [resolvable:$true] %s181_s17 }
  0x24   : > { %940 = dma.hbm_to_vmem [thread:$0]  (!%p938_p9), %s182_s17, 2048, %s184_s28, %s170_s30, %s1670_s11, %s1671_s4, %s1672_s22  }
  0x25   : > { %p89_p3 = scmp.ne.s32.totalorder %s1211_s15, %s1207_s14  ;;  %p1425_p5 = por %p83_p13, %p56_p2 }
  0x26   : > { %s104_s7 = sadd.s32 1, %s1203_s13  ;;  %s1740_s3 = smov (%p37_p1, %s1738_s3), 0 }
  0x27   : > { %1695 = sst [smem:[#allocation17_spill]] %s1740_s3  ;;  %s1696_s10 = sadd.s32 1, %s1251_s25 }
  0x28   : > { %s1742_s10 = smov (!%p37_p1, %s1696_s10), %s1251_s25  ;;  %s72_s29 = ssub.s32 %s1247_s24, %s1740_s3 }
  0x29   : > { %p1439_p0 = por %p89_p3, %p1374_p4  ;;  %p41_p2 = scmp.ge.s32.totalorder %s1742_s10, 2 }
  0x2a   : > { %s73_s14 = sor.u32 %s72_s29, %s1372_s5  ;;  %p114_p10 = scmp.ne.s32.totalorder %s1203_s13, %s1199_s12 }
  0x2b   : > { %p74_p9 = scmp.eq.s32.totalorder %s73_s14, 0  ;;  %s1744_s10 = smov (%p41_p2, %s1742_s10), 0 }
  0x2c   : > { %1698 = sst [smem:[#allocation18_spill]] %s1744_s10  ;;  %s43_s30 = ssub.s32 %s1251_s25, %s1744_s10 }
  0x2d   : > { %s1449_s17 = scalar_select %p74_p9, %s1215_s16, %s76_s21  }
  0x2e   : > { %p1455_p11 = por %p1384_p6, %p114_p10  ;;  %s45_s11 = sor.u32 %s1372_s5, %s43_s30 }
  0x2f   : > { %1699 = sst [smem:[#allocation19_spill]] %s1449_s17  ;;  %s101_s4 = sor.u32 %s72_s29, %s43_s30 }
  0x30   : > { %s1700_s6 = scalar_select %p1455_p11, 1, 0 }
  0x31   : > { %p46_p4 = scmp.eq.s32.totalorder %s45_s11, 0  ;;  %p102_p13 = scmp.eq.s32.totalorder %s101_s4, 0 }
  0x32   : > { %1701 = sst [smem:[#allocation20_spill]] %s1700_s6  ;;  %s193_s22 = sand.u32 1, %s1215_s16  }
  0x33   : > { %s882_s14 = sshll.u32 %s1243_s23, 5  ;;  %s1702_s0 = sadd.s32 1, %s1227_s19 }
  0x34   : > { %s1465_s3 = scalar_select %p46_p4, %s1227_s19, %s1702_s0  }
  0x35   : > { %s1468_s20 = scalar_select %p102_p13, %s1203_s13, %s104_s7  }
  0x36   : > { %s860_s21 = sshll.u32 %s193_s22, 7  ;;  %s202_s10 = sadd.s32 %s1247_s24, %s882_s14 }
  0x37   : > { %s863_s8 = sshll.u32 %s202_s10, 3  ;;  %s197_s25 = scalar_lea.vmem [#allocation5], %s860_s21 }
  0x38   : > { %s207_s17 = sshll.u32 %s197_s25, 4  ;;  %s204_s5 = scalar_lea.hbm %s1666_s1, %s863_s8  ;;  %s208_s17 = int_to_ptr.vmem [resolvable:$true] %s207_s17 }
  0x39   : > { %s205_s29 = sshll.u32 %s204_s5, 4  ;;  %p941_p6 = pnand %p944_p8, %p1425_p5  ;;  %s206_s29 = int_to_ptr.hbm [resolvable:$true] %s205_s29 }
  0x3a   : > { %s194_s11 = scalar_lea.sflag [#allocation6], %s193_s22  ;;  %s1703_s0 = smov 8  }
  0x3b   : > { %s1704_s4 = smov 128   ;;  %s1705_s7 = smov 256  }
  0x3c   : > { %943 = dma.hbm_to_vmem [thread:$0]  (!%p941_p6), %s206_s29, 2048, %s208_s17, %s194_s11, %s1705_s7, %s1704_s4, %s1703_s0  }
  0x3d   : > { %219 = sbr.rel (%p1410_p12) target bundleno = 379 (0x17b), region = 28  ;;  %s221_s25 = sand.u32 (!%p1410_p12), 1, %s1223_s18  }
  0x3e   : > { %s865_s10 = sshll.u32 (!%p1410_p12), %s221_s25, 7  ;;  %s222_s12 = scalar_lea.sflag (!%p1410_p12), [#allocation4], %s221_s25 }
  0x3f   : > { %s1484_s30 = scalar_lea.vmem (!%p1410_p12), [#allocation3], %s865_s10 }
  0x42   : > { %1190 = dma.done.wait (%p1390_p7), %s222_s12, 2048  }
  0x43   : > { %1192 = vsyncadd (%p1390_p7), %s222_s12, 4294965248  ;;  %s231_s22 = sand.u32 1, %s1211_s15  }
  0x44   : > { %s866_s28 = sshll.u32 %s231_s22, 7  ;;  %s232_s17 = scalar_lea.sflag [#allocation6], %s231_s22 }
  0x45   : > { %s1491_s6 = scalar_lea.vmem [#allocation5], %s866_s28 }
  0x46   : > { %1194 = dma.done.wait (%p1439_p0), %s232_s17, 2048  }
  0x47   : > { %1196 = vsyncadd (%p1439_p0), %s232_s17, 4294965248  ;;  %s1706_s2 = sld [smem:[#allocation11_spill]] }
  0x48   : > { %s1707_s9 = sld [smem:[#allocation12_spill]] }
  0x4d   : > { %s258_s14 = sand.u32 1, %s1706_s2  }
  0x4e   : > { %s867_s21 = sshll.u32 %s258_s14, 7  ;;  %p869_p7 = scmp.ne.s32.totalorder %s1707_s9, 0 }
  0x4f   : > { %s1498_s8 = scalar_lea.vmem [#allocation7], %s867_s21  ;;  %s1500_s5 = scalar_lea.vmem [#allocation8], %s867_s21 }
  0x50   : > { %274 = sbr.rel (%p869_p7) target bundleno = 102 (0x66), region = 40 }
  0x55   : > { %v1260_v0 = vmov 0.0  }
  0x56   : > { %275 = vst [vmem:[#allocation2 + $0x30] sm:$0xff] %v1260_v0 }
  0x57   : > { %276 = vst [vmem:[#allocation2] sm:$0xff] %v1260_v0 }
  0x58   : > { %277 = vst [vmem:[#allocation2 + $0x58] sm:$0xff] %v1260_v0 }
  0x59   : > { %278 = vst [vmem:[#allocation2 + $0x18] sm:$0xff] %v1260_v0 }
  0x5a   : > { %279 = vst [vmem:[#allocation2 + $0x50] sm:$0xff] %v1260_v0 }
  0x5b   : > { %280 = vst [vmem:[#allocation2 + $0x68] sm:$0xff] %v1260_v0 }
  0x5c   : > { %281 = vst [vmem:[#allocation2 + $0x8] sm:$0xff] %v1260_v0 }
  0x5d   : > { %282 = vst [vmem:[#allocation2 + $0x48] sm:$0xff] %v1260_v0 }
  0x5e   : > { %283 = vst [vmem:[#allocation2 + $0x40] sm:$0xff] %v1260_v0 }
  0x5f   : > { %284 = vst [vmem:[#allocation2 + $0x20] sm:$0xff] %v1260_v0 }
  0x60   : > { %285 = vst [vmem:[#allocation2 + $0x10] sm:$0xff] %v1260_v0 }
  0x61   : > { %286 = vst [vmem:[#allocation2 + $0x38] sm:$0xff] %v1260_v0 }
  0x62   : > { %287 = vst [vmem:[#allocation2 + $0x60] sm:$0xff] %v1260_v0 }
  0x63   : > { %288 = vst [vmem:[#allocation2 + $0x70] sm:$0xff] %v1260_v0 }
  0x64   : > { %289 = vst [vmem:[#allocation2 + $0x78] sm:$0xff] %v1260_v0 }
  0x65   : > { %290 = vst [vmem:[#allocation2 + $0x28] sm:$0xff] %v1260_v0 }
  0x66 PF: > { %v338_v1 = vld [vmem:[%s1491_s6 + $0x78] sm:$0xff]  ;;  %v337_v2 = vld [vmem:[%s1491_s6 + $0x70] sm:$0xff]  ;;  %v336_v3 = vld [vmem:[%s1491_s6 + $0x68] sm:$0xff]  ;;  %s1708_s27 = sld [smem:[#allocation12_spill]] }
  0x67   : > { %886 = vmatpush.msra.mxu2 %v338_v1  ;;  %887 = vmatpush.msra.mxu3 %v338_v1  ;;  %v335_v4 = vld [vmem:[%s1491_s6 + $0x60] sm:$0xff]  ;;  %v334_v5 = vld [vmem:[%s1491_s6 + $0x58] sm:$0xff]  ;;  %v333_v6 = vld [vmem:[%s1491_s6 + $0x50] sm:$0xff] }
  0x68   : > { %339 = vmatpush.msra.mxu0 %v338_v1  ;;  %885 = vmatpush.msra.mxu1 %v338_v1  ;;  %v332_v7 = vld [vmem:[%s1491_s6 + $0x48] sm:$0xff]  ;;  %v331_v8 = vld [vmem:[%s1491_s6 + $0x40] sm:$0xff]  ;;  %v330_v9 = vld [vmem:[%s1491_s6 + $0x38] sm:$0xff] }
  0x69   : > { %889 = vmatpush.msra.mxu2 %v337_v2  ;;  %890 = vmatpush.msra.mxu3 %v337_v2  ;;  %v329_v10 = vld [vmem:[%s1491_s6 + $0x30] sm:$0xff]  ;;  %v328_v11 = vld [vmem:[%s1491_s6 + $0x28] sm:$0xff]  ;;  %v327_v12 = vld [vmem:[%s1491_s6 + $0x20] sm:$0xff] }
  0x6a   : > { %340 = vmatpush.msra.mxu0 %v337_v2  ;;  %888 = vmatpush.msra.mxu1 %v337_v2  ;;  %v326_v13 = vld [vmem:[%s1491_s6 + $0x18] sm:$0xff]  ;;  %v325_v14 = vld [vmem:[%s1491_s6 + $0x10] sm:$0xff]  ;;  %v324_v15 = vld [vmem:[%s1491_s6 + $0x8] sm:$0xff] }
  0x6b   : > { %892 = vmatpush.msra.mxu2 %v336_v3  ;;  %893 = vmatpush.msra.mxu3 %v336_v3  ;;  %v323_v16 = vld [vmem:[%s1491_s6] sm:$0xff]  ;;  %v316_v21 = vld [vmem:[%s1484_s30 + $0x48] sm:$0xff]  ;;  %v317_v25 = vld [vmem:[%s1484_s30 + $0x50] sm:$0xff] }
  0x6c   : > { %341 = vmatpush.msra.mxu0 %v336_v3  ;;  %891 = vmatpush.msra.mxu1 %v336_v3  ;;  %v315_v17 = vld [vmem:[%s1484_s30 + $0x40] sm:$0xff]  ;;  %v320_v22 = vld [vmem:[%s1484_s30 + $0x68] sm:$0xff]  ;;  %v321_v26 = vld [vmem:[%s1484_s30 + $0x70] sm:$0xff]  ;;  %p870_p8 = scmp.ne.s32.totalorder %s1708_s27, 1 }
  0x6d   : > { %895 = vmatpush.msra.mxu2 %v335_v4  ;;  %896 = vmatpush.msra.mxu3 %v335_v4  ;;  %v319_v18 = vld [vmem:[%s1484_s30 + $0x60] sm:$0xff]  ;;  %v308_v23 = vld [vmem:[%s1484_s30 + $0x8] sm:$0xff]  ;;  %v309_v27 = vld [vmem:[%s1484_s30 + $0x10] sm:$0xff] }
  0x6e   : > { %342 = vmatpush.msra.mxu0 %v335_v4  ;;  %894 = vmatpush.msra.mxu1 %v335_v4  ;;  %v307_v19 = vld [vmem:[%s1484_s30] sm:$0xff]  ;;  %v312_v24 = vld [vmem:[%s1484_s30 + $0x28] sm:$0xff]  ;;  %v313_v28 = vld [vmem:[%s1484_s30 + $0x30] sm:$0xff] }
  0x6f   : > { %898 = vmatpush.msra.mxu2 %v334_v5  ;;  %899 = vmatpush.msra.mxu3 %v334_v5  ;;  %v311_v20 = vld [vmem:[%s1484_s30 + $0x20] sm:$0xff]  ;;  %v318_v29 = vld [vmem:[%s1484_s30 + $0x58] sm:$0xff]  ;;  %v291_v33 = vld [vmem:[#allocation2 + $0x30] sm:$0xff] }
  0x70   : > { %343 = vmatpush.msra.mxu0 %v334_v5  ;;  %897 = vmatpush.msra.mxu1 %v334_v5  ;;  %v322_v30 = vld [vmem:[%s1484_s30 + $0x78] sm:$0xff]  ;;  %v295_v34 = vld [vmem:[#allocation2 + $0x50] sm:$0xff]  ;;  %v299_v39 = vld [vmem:[#allocation2 + $0x40] sm:$0xff] }
  0x71   : > { %901 = vmatpush.msra.mxu2 %v333_v6  ;;  %902 = vmatpush.msra.mxu3 %v333_v6  ;;  %v310_v31 = vld [vmem:[%s1484_s30 + $0x18] sm:$0xff]  ;;  %v303_v40 = vld [vmem:[#allocation2 + $0x60] sm:$0xff]  ;;  %v296_v46 = vld [vmem:[#allocation2 + $0x68] sm:$0xff] }
  0x72   : > { %344 = vmatpush.msra.mxu0 %v333_v6  ;;  %900 = vmatpush.msra.mxu1 %v333_v6  ;;  %v314_v32 = vld [vmem:[%s1484_s30 + $0x38] sm:$0xff]  ;;  %v292_v45 = vld [vmem:[#allocation2] sm:$0xff]  ;;  %v304_v52 = vld [vmem:[#allocation2 + $0x70] sm:$0xff] }
  0x73   : > { %904 = vmatpush.msra.mxu2 %v332_v7  ;;  %905 = vmatpush.msra.mxu3 %v332_v7  ;;  %v300_v51 = vld [vmem:[#allocation2 + $0x20] sm:$0xff]  ;;  %v293_v57 = vld [vmem:[#allocation2 + $0x58] sm:$0xff]  ;;  %v297_v58 = vld [vmem:[#allocation2 + $0x8] sm:$0xff] }
  0x74   : > { %345 = vmatpush.msra.mxu0 %v332_v7  ;;  %903 = vmatpush.msra.mxu1 %v332_v7  ;;  %v301_v63 = vld [vmem:[#allocation2 + $0x10] sm:$0xff]  ;;  %v305_v0 = vld [vmem:[#allocation2 + $0x78] sm:$0xff]  ;;  %v298_v6 = vld [vmem:[#allocation2 + $0x48] sm:$0xff] }
  0x75   : > { %907 = vmatpush.msra.mxu2 %v331_v8  ;;  %908 = vmatpush.msra.mxu3 %v331_v8  ;;  %v294_v5 = vld [vmem:[#allocation2 + $0x18] sm:$0xff] }
  0x76   : > { %346 = vmatpush.msra.mxu0 %v331_v8  ;;  %906 = vmatpush.msra.mxu1 %v331_v8 }
  0x77   : > { %910 = vmatpush.msra.mxu2 %v330_v9  ;;  %911 = vmatpush.msra.mxu3 %v330_v9 }
  0x78   : > { %347 = vmatpush.msra.mxu0 %v330_v9  ;;  %909 = vmatpush.msra.mxu1 %v330_v9 }
  0x79   : > { %913 = vmatpush.msra.mxu2 %v329_v10  ;;  %914 = vmatpush.msra.mxu3 %v329_v10 }
  0x7a   : > { %348 = vmatpush.msra.mxu0 %v329_v10  ;;  %912 = vmatpush.msra.mxu1 %v329_v10 }
  0x7b   : > { %916 = vmatpush.msra.mxu2 %v328_v11  ;;  %917 = vmatpush.msra.mxu3 %v328_v11 }
  0x7c   : > { %349 = vmatpush.msra.mxu0 %v328_v11  ;;  %915 = vmatpush.msra.mxu1 %v328_v11  ;;  %v302_v11 = vld [vmem:[#allocation2 + $0x38] sm:$0xff] }
  0x7d   : > { %919 = vmatpush.msra.mxu2 %v327_v12  ;;  %920 = vmatpush.msra.mxu3 %v327_v12 }
  0x7e   : > { %350 = vmatpush.msra.mxu0 %v327_v12  ;;  %918 = vmatpush.msra.mxu1 %v327_v12  ;;  %v306_v12 = vld [vmem:[#allocation2 + $0x28] sm:$0xff] }
  0x7f   : > { %922 = vmatpush.msra.mxu2 %v326_v13  ;;  %923 = vmatpush.msra.mxu3 %v326_v13 }
  0x80   : > { %351 = vmatpush.msra.mxu0 %v326_v13  ;;  %921 = vmatpush.msra.mxu1 %v326_v13 }
  0x81   : > { %925 = vmatpush.msra.mxu2 %v325_v14  ;;  %926 = vmatpush.msra.mxu3 %v325_v14 }
  0x82   : > { %352 = vmatpush.msra.mxu0 %v325_v14  ;;  %924 = vmatpush.msra.mxu1 %v325_v14 }
  0x83   : > { %928 = vmatpush.msra.mxu2 %v324_v15  ;;  %929 = vmatpush.msra.mxu3 %v324_v15 }
  0x84   : > { %353 = vmatpush.msra.mxu0 %v324_v15  ;;  %927 = vmatpush.msra.mxu1 %v324_v15 }
  0x85   : > { %931 = vmatpush.msra.mxu2 %v323_v16  ;;  %932 = vmatpush.msra.mxu3 %v323_v16 }
  0x86   : > { %379 = vmatmul.f32.vlgmr.msra.gmra.mxu2 %v315_v17  ;;  %391 = vmatmul.f32.vlgmr.msra.gmra.mxu3 %v319_v18 }
  0x87   : > { %354 = vmatpush.msra.mxu0 %v323_v16  ;;  %930 = vmatpush.msra.mxu1 %v323_v16 }
  0x88   : > { %355 = vmatmul.f32.vlgmr.msra.gmra.mxu0 %v307_v19  ;;  %367 = vmatmul.f32.vlgmr.msra.gmra.mxu1 %v311_v20 }
  0x8e   : > { %382 = vmatmul.f32.gmra.mxu2 %v316_v21  ;;  %394 = vmatmul.f32.gmra.mxu3 %v320_v22 }
  0x90   : > { %358 = vmatmul.f32.gmra.mxu0 %v308_v23  ;;  %370 = vmatmul.f32.gmra.mxu1 %v312_v24 }
  0x96   : > { %385 = vmatmul.f32.gmra.mxu2 %v317_v25  ;;  %397 = vmatmul.f32.gmra.mxu3 %v321_v26 }
  0x98   : > { %361 = vmatmul.f32.gmra.mxu0 %v309_v27  ;;  %373 = vmatmul.f32.gmra.mxu1 %v313_v28 }
  0x9e   : > { %388 = vmatmul.f32.gmra.mxu2 %v318_v29  ;;  %400 = vmatmul.f32.gmra.mxu3 %v322_v30 }
  0xa0   : > { %364 = vmatmul.f32.gmra.mxu0 %v310_v31  ;;  %376 = vmatmul.f32.gmra.mxu1 %v314_v32 }
 0x105   : > { %v356_v35 = vpop.f32.mrf.mxu0  ;;  %v368_v36 = vpop.f32.mrf.mxu1 }
 0x106   : > { %v404_v37 = vadd.f32 %v356_v35, %v291_v33  ;;  %v408_v38 = vadd.f32 %v368_v36, %v295_v34 }
 0x108   : > { %420 = vst [vmem:[#allocation2 + $0x30] sm:$0xff] %v404_v37 }
 0x109   : > { %424 = vst [vmem:[#allocation2 + $0x50] sm:$0xff] %v408_v38  ;;  %v380_v41 = vpop.f32.mrf.mxu2  ;;  %v392_v42 = vpop.f32.mrf.mxu3 }
 0x10a   : > { %v412_v43 = vadd.f32 %v380_v41, %v299_v39  ;;  %v416_v44 = vadd.f32 %v392_v42, %v303_v40 }
 0x10c   : > { %428 = vst [vmem:[#allocation2 + $0x40] sm:$0xff] %v412_v43 }
 0x10d   : > { %432 = vst [vmem:[#allocation2 + $0x60] sm:$0xff] %v416_v44  ;;  %v359_v47 = vpop.f32.mrf.mxu0  ;;  %v371_v48 = vpop.f32.mrf.mxu1 }
 0x10e   : > { %v405_v49 = vadd.f32 %v359_v47, %v292_v45  ;;  %v409_v50 = vadd.f32 %v371_v48, %v296_v46 }
 0x110   : > { %421 = vst [vmem:[#allocation2] sm:$0xff] %v405_v49 }
 0x111   : > { %425 = vst [vmem:[#allocation2 + $0x68] sm:$0xff] %v409_v50  ;;  %v383_v53 = vpop.f32.mrf.mxu2  ;;  %v395_v54 = vpop.f32.mrf.mxu3 }
 0x112   : > { %v413_v55 = vadd.f32 %v383_v53, %v300_v51  ;;  %v417_v56 = vadd.f32 %v395_v54, %v304_v52 }
 0x114   : > { %429 = vst [vmem:[#allocation2 + $0x20] sm:$0xff] %v413_v55 }
 0x115   : > { %433 = vst [vmem:[#allocation2 + $0x70] sm:$0xff] %v417_v56  ;;  %v362_v59 = vpop.f32.mrf.mxu0  ;;  %v374_v60 = vpop.f32.mrf.mxu1 }
 0x116   : > { %v406_v61 = vadd.f32 %v362_v59, %v293_v57  ;;  %v410_v62 = vadd.f32 %v374_v60, %v297_v58 }
 0x118   : > { %422 = vst [vmem:[#allocation2 + $0x58] sm:$0xff] %v406_v61 }
 0x119   : > { %426 = vst [vmem:[#allocation2 + $0x8] sm:$0xff] %v410_v62  ;;  %v386_v1 = vpop.f32.mrf.mxu2  ;;  %v398_v2 = vpop.f32.mrf.mxu3 }
 0x11a   : > { %v414_v3 = vadd.f32 %v386_v1, %v301_v63  ;;  %v418_v4 = vadd.f32 %v398_v2, %v305_v0 }
 0x11c   : > { %430 = vst [vmem:[#allocation2 + $0x10] sm:$0xff] %v414_v3 }
 0x11d   : > { %434 = vst [vmem:[#allocation2 + $0x78] sm:$0xff] %v418_v4  ;;  %v365_v7 = vpop.f32.mrf.mxu0  ;;  %v377_v8 = vpop.f32.mrf.mxu1 }
 0x11e   : > { %v407_v9 = vadd.f32 %v365_v7, %v294_v5  ;;  %v411_v10 = vadd.f32 %v377_v8, %v298_v6 }
 0x120   : > { %423 = vst [vmem:[#allocation2 + $0x18] sm:$0xff] %v407_v9 }
 0x121   : > { %427 = vst [vmem:[#allocation2 + $0x48] sm:$0xff] %v411_v10  ;;  %v389_v13 = vpop.f32.mrf.mxu2  ;;  %v401_v14 = vpop.f32.mrf.mxu3  ;;  %439 = sbr.rel (%p870_p8) target bundleno = 327 (0x147), region = 44 }
 0x122   : > { %v415_v15 = vadd.f32 %v389_v13, %v302_v11  ;;  %v419_v16 = vadd.f32 %v401_v14, %v306_v12 }
 0x124   : > { %431 = vst [vmem:[#allocation2 + $0x38] sm:$0xff] %v415_v15 }
 0x125   : > { %435 = vst [vmem:[#allocation2 + $0x28] sm:$0xff] %v419_v16 }
 0x126   : > { %v440_v17 = vld [vmem:[#allocation2 + $0x30] sm:$0xff]  ;;  %v441_v18 = vld [vmem:[#allocation2] sm:$0xff]  ;;  %v442_v19 = vld [vmem:[#allocation2 + $0x58] sm:$0xff] }
 0x127   : > { %456 = vst [vmem:[%s1498_s8] sm:$0xff] %v440_v17  ;;  %v443_v20 = vld [vmem:[#allocation2 + $0x18] sm:$0xff]  ;;  %v444_v21 = vld [vmem:[#allocation2 + $0x50] sm:$0xff]  ;;  %v445_v22 = vld [vmem:[#allocation2 + $0x68] sm:$0xff]  ;;  %v472_v31 = vmul.f32 %v440_v17, %v440_v17  ;;  %v473_v33 = vmul.f32 %v441_v18, %v441_v18  ;;  %v474_v35 = vmul.f32 %v442_v19, %v442_v19 }
 0x128   : > { %457 = vst [vmem:[%s1498_s8 + $0x8] sm:$0xff] %v441_v18  ;;  %v446_v23 = vld [vmem:[#allocation2 + $0x8] sm:$0xff]  ;;  %v448_v25 = vld [vmem:[#allocation2 + $0x40] sm:$0xff]  ;;  %v450_v27 = vld [vmem:[#allocation2 + $0x10] sm:$0xff]  ;;  %v475_v36 = vmul.f32 %v443_v20, %v443_v20  ;;  %v476_v37 = vmul.f32 %v444_v21, %v444_v21  ;;  %v477_v38 = vmul.f32 %v445_v22, %v445_v22 }
 0x129   : > { %458 = vst [vmem:[%s1498_s8 + $0x10] sm:$0xff] %v442_v19  ;;  %v447_v24 = vld [vmem:[#allocation2 + $0x48] sm:$0xff]  ;;  %v449_v26 = vld [vmem:[#allocation2 + $0x20] sm:$0xff]  ;;  %v453_v30 = vld [vmem:[#allocation2 + $0x70] sm:$0xff]  ;;  %v478_v39 = vmul.f32 %v446_v23, %v446_v23  ;;  %v480_v41 = vmul.f32 %v448_v25, %v448_v25  ;;  %v482_v43 = vmul.f32 %v450_v27, %v450_v27 }
 0x12a   : > { %459 = vst [vmem:[%s1498_s8 + $0x18] sm:$0xff] %v443_v20  ;;  %v452_v29 = vld [vmem:[#allocation2 + $0x60] sm:$0xff]  ;;  %v454_v32 = vld [vmem:[#allocation2 + $0x78] sm:$0xff]  ;;  %v479_v40 = vmul.f32 %v447_v24, %v447_v24  ;;  %v481_v42 = vmul.f32 %v449_v26, %v449_v26  ;;  %v485_v46 = vmul.f32 %v453_v30, %v453_v30 }
 0x12b   : > { %460 = vst [vmem:[%s1498_s8 + $0x20] sm:$0xff] %v444_v21  ;;  %v451_v28 = vld [vmem:[#allocation2 + $0x38] sm:$0xff]  ;;  %v484_v45 = vmul.f32 %v452_v29, %v452_v29  ;;  %v486_v47 = vmul.f32 %v454_v32, %v454_v32 }
 0x12c   : > { %461 = vst [vmem:[%s1498_s8 + $0x28] sm:$0xff] %v445_v22  ;;  %v455_v34 = vld [vmem:[#allocation2 + $0x28] sm:$0xff]  ;;  %v483_v44 = vmul.f32 %v451_v28, %v451_v28 }
 0x12d   : > { %462 = vst [vmem:[%s1498_s8 + $0x30] sm:$0xff] %v446_v23  ;;  %v487_v48 = vmul.f32 %v455_v34, %v455_v34 }
 0x12e   : > { %463 = vst [vmem:[%s1498_s8 + $0x38] sm:$0xff] %v447_v24 }
 0x12f   : > { %464 = vst [vmem:[%s1498_s8 + $0x40] sm:$0xff] %v448_v25 }
 0x130   : > { %465 = vst [vmem:[%s1498_s8 + $0x48] sm:$0xff] %v449_v26 }
 0x131   : > { %466 = vst [vmem:[%s1498_s8 + $0x50] sm:$0xff] %v450_v27 }
 0x132   : > { %467 = vst [vmem:[%s1498_s8 + $0x58] sm:$0xff] %v451_v28 }
 0x133   : > { %468 = vst [vmem:[%s1498_s8 + $0x60] sm:$0xff] %v452_v29 }
 0x134   : > { %469 = vst [vmem:[%s1498_s8 + $0x68] sm:$0xff] %v453_v30 }
 0x135   : > { %470 = vst [vmem:[%s1498_s8 + $0x70] sm:$0xff] %v454_v32 }
 0x136   : > { %471 = vst [vmem:[%s1498_s8 + $0x78] sm:$0xff] %v455_v34 }
 0x137   : > { %488 = vst [vmem:[%s1500_s5] sm:$0xff] %v472_v31 }
 0x138   : > { %489 = vst [vmem:[%s1500_s5 + $0x8] sm:$0xff] %v473_v33 }
 0x139   : > { %490 = vst [vmem:[%s1500_s5 + $0x10] sm:$0xff] %v474_v35 }
 0x13a   : > { %491 = vst [vmem:[%s1500_s5 + $0x18] sm:$0xff] %v475_v36 }
 0x13b   : > { %492 = vst [vmem:[%s1500_s5 + $0x20] sm:$0xff] %v476_v37 }
 0x13c   : > { %493 = vst [vmem:[%s1500_s5 + $0x28] sm:$0xff] %v477_v38 }
 0x13d   : > { %494 = vst [vmem:[%s1500_s5 + $0x30] sm:$0xff] %v478_v39 }
 0x13e   : > { %495 = vst [vmem:[%s1500_s5 + $0x38] sm:$0xff] %v479_v40 }
 0x13f   : > { %496 = vst [vmem:[%s1500_s5 + $0x40] sm:$0xff] %v480_v41 }
 0x140   : > { %497 = vst [vmem:[%s1500_s5 + $0x48] sm:$0xff] %v481_v42 }
 0x141   : > { %498 = vst [vmem:[%s1500_s5 + $0x50] sm:$0xff] %v482_v43 }
 0x142   : > { %499 = vst [vmem:[%s1500_s5 + $0x58] sm:$0xff] %v483_v44 }
 0x143   : > { %500 = vst [vmem:[%s1500_s5 + $0x60] sm:$0xff] %v484_v45 }
 0x144   : > { %501 = vst [vmem:[%s1500_s5 + $0x68] sm:$0xff] %v485_v46 }
 0x145   : > { %502 = vst [vmem:[%s1500_s5 + $0x70] sm:$0xff] %v486_v47 }
 0x146   : > { %503 = vst [vmem:[%s1500_s5 + $0x78] sm:$0xff] %v487_v48 }
 0x147 PF: > { %514 = sbr.rel (!%p1455_p11) target bundleno = 353 (0x161), region = 48  ;;  %s1710_s11 = sld [smem:[#allocation14_spill]] (%p1455_p11)  ;;  %v578_v49 = vld [vmem:[%s1498_s8] sm:$0xff] (%p1455_p11)  ;;  %v580_v50 = vld [vmem:[%s1498_s8 + $0x8] sm:$0xff] (%p1455_p11)  ;;  %v582_v51 = vld [vmem:[%s1498_s8 + $0x10] sm:$0xff] (%p1455_p11) }
 0x148   : > { %s1711_s0 = sld [smem:[#allocation13_spill]] (%p1455_p11)  ;;  %v584_v52 = vld [vmem:[%s1498_s8 + $0x18] sm:$0xff] (%p1455_p11)  ;;  %v586_v53 = vld [vmem:[%s1498_s8 + $0x20] sm:$0xff] (%p1455_p11)  ;;  %v588_v54 = vld [vmem:[%s1498_s8 + $0x28] sm:$0xff] (%p1455_p11) }
 0x149   : > { %s1712_s30 = sld [smem:[#allocation22_spill]] (%p1455_p11)  ;;  %v590_v55 = vld [vmem:[%s1498_s8 + $0x30] sm:$0xff] (%p1455_p11)  ;;  %v592_v56 = vld [vmem:[%s1498_s8 + $0x38] sm:$0xff] (%p1455_p11)  ;;  %v594_v57 = vld [vmem:[%s1498_s8 + $0x40] sm:$0xff] (%p1455_p11) }
 0x14a   : > { %v596_v58 = vld [vmem:[%s1498_s8 + $0x48] sm:$0xff] (%p1455_p11)  ;;  %v598_v59 = vld [vmem:[%s1498_s8 + $0x50] sm:$0xff] (%p1455_p11)  ;;  %v600_v60 = vld [vmem:[%s1498_s8 + $0x58] sm:$0xff] (%p1455_p11) }
 0x14b   : > { %v602_v61 = vld [vmem:[%s1498_s8 + $0x60] sm:$0xff] (%p1455_p11)  ;;  %v604_v62 = vld [vmem:[%s1498_s8 + $0x68] sm:$0xff] (%p1455_p11)  ;;  %v606_v63 = vld [vmem:[%s1498_s8 + $0x70] sm:$0xff] (%p1455_p11) }
 0x14c   : > { %v608_v0 = vld [vmem:[%s1498_s8 + $0x78] sm:$0xff] }
 0x14d   : > { %s883_s4 = sshll.u32 %s1710_s11, 5 }
 0x14e   : > { %s517_s7 = sadd.s32 %s1711_s0, %s883_s4 }
 0x14f   : > { %s875_s25 = sshll.u32 %s517_s7, 3 }
 0x150   : > { %s519_s22 = scalar_lea.vmem %s1712_s30, %s875_s25 }
 0x151   : > { %579 = vst [vmem:[%s519_s22] sm:$0xff] %v578_v49 }
 0x152   : > { %581 = vst [vmem:[%s519_s22 + $0x10] sm:$0xff] %v580_v50 }
 0x153   : > { %583 = vst [vmem:[%s519_s22 + $0x20] sm:$0xff] %v582_v51 }
 0x154   : > { %585 = vst [vmem:[%s519_s22 + $0x30] sm:$0xff] %v584_v52 }
 0x155   : > { %587 = vst [vmem:[%s519_s22 + $0x40] sm:$0xff] %v586_v53 }
 0x156   : > { %589 = vst [vmem:[%s519_s22 + $0x50] sm:$0xff] %v588_v54 }
 0x157   : > { %591 = vst [vmem:[%s519_s22 + $0x60] sm:$0xff] %v590_v55 }
 0x158   : > { %593 = vst [vmem:[%s519_s22 + $0x70] sm:$0xff] %v592_v56 }
 0x159   : > { %595 = vst [vmem:[%s519_s22 + $0x80] sm:$0xff] %v594_v57 }
 0x15a   : > { %597 = vst [vmem:[%s519_s22 + $0x90] sm:$0xff] %v596_v58 }
 0x15b   : > { %599 = vst [vmem:[%s519_s22 + $0xa0] sm:$0xff] %v598_v59 }
 0x15c   : > { %601 = vst [vmem:[%s519_s22 + $0xb0] sm:$0xff] %v600_v60 }
 0x15d   : > { %603 = vst [vmem:[%s519_s22 + $0xc0] sm:$0xff] %v602_v61 }
 0x15e   : > { %605 = vst [vmem:[%s519_s22 + $0xd0] sm:$0xff] %v604_v62 }
 0x15f   : > { %607 = vst [vmem:[%s519_s22 + $0xe0] sm:$0xff] %v606_v63 }
 0x160   : > { %609 = vst [vmem:[%s519_s22 + $0xf0] sm:$0xff] %v608_v0 }
 0x161 PF: > { %615 = sbr.rel (!%p1455_p11) target bundleno = 379 (0x17b), region = 86  ;;  %s1714_s17 = sld [smem:[#allocation14_spill]] (%p1455_p11)  ;;  %v679_v1 = vld [vmem:[%s1500_s5] sm:$0xff] (%p1455_p11)  ;;  %v681_v2 = vld [vmem:[%s1500_s5 + $0x8] sm:$0xff] (%p1455_p11)  ;;  %v683_v3 = vld [vmem:[%s1500_s5 + $0x10] sm:$0xff] (%p1455_p11) }
 0x162   : > { %s1715_s6 = sld [smem:[#allocation13_spill]] (%p1455_p11)  ;;  %v685_v4 = vld [vmem:[%s1500_s5 + $0x18] sm:$0xff] (%p1455_p11)  ;;  %v687_v5 = vld [vmem:[%s1500_s5 + $0x20] sm:$0xff] (%p1455_p11)  ;;  %v689_v6 = vld [vmem:[%s1500_s5 + $0x28] sm:$0xff] (%p1455_p11) }
 0x163   : > { %s1716_s27 = sld [smem:[#allocation23_spill]] (%p1455_p11)  ;;  %v691_v7 = vld [vmem:[%s1500_s5 + $0x30] sm:$0xff] (%p1455_p11)  ;;  %v693_v8 = vld [vmem:[%s1500_s5 + $0x38] sm:$0xff] (%p1455_p11)  ;;  %v695_v9 = vld [vmem:[%s1500_s5 + $0x40] sm:$0xff] (%p1455_p11) }
 0x164   : > { %v697_v10 = vld [vmem:[%s1500_s5 + $0x48] sm:$0xff] (%p1455_p11)  ;;  %v699_v11 = vld [vmem:[%s1500_s5 + $0x50] sm:$0xff] (%p1455_p11)  ;;  %v701_v12 = vld [vmem:[%s1500_s5 + $0x58] sm:$0xff] (%p1455_p11) }
 0x165   : > { %v703_v13 = vld [vmem:[%s1500_s5 + $0x60] sm:$0xff] (%p1455_p11)  ;;  %v705_v14 = vld [vmem:[%s1500_s5 + $0x68] sm:$0xff] (%p1455_p11)  ;;  %v707_v15 = vld [vmem:[%s1500_s5 + $0x70] sm:$0xff] (%p1455_p11) }
 0x166   : > { %v709_v16 = vld [vmem:[%s1500_s5 + $0x78] sm:$0xff] }
 0x167   : > { %s884_s2 = sshll.u32 %s1714_s17, 5 }
 0x168   : > { %s618_s14 = sadd.s32 %s1715_s6, %s884_s2 }
 0x169   : > { %s878_s21 = sshll.u32 %s618_s14, 3 }
 0x16a   : > { %s620_s29 = scalar_lea.vmem %s1716_s27, %s878_s21 }
 0x16b   : > { %680 = vst [vmem:[%s620_s29] sm:$0xff] %v679_v1 }
 0x16c   : > { %682 = vst [vmem:[%s620_s29 + $0x10] sm:$0xff] %v681_v2 }
 0x16d   : > { %684 = vst [vmem:[%s620_s29 + $0x20] sm:$0xff] %v683_v3 }
 0x16e   : > { %686 = vst [vmem:[%s620_s29 + $0x30] sm:$0xff] %v685_v4 }
 0x16f   : > { %688 = vst [vmem:[%s620_s29 + $0x40] sm:$0xff] %v687_v5 }
 0x170   : > { %690 = vst [vmem:[%s620_s29 + $0x50] sm:$0xff] %v689_v6 }
 0x171   : > { %692 = vst [vmem:[%s620_s29 + $0x60] sm:$0xff] %v691_v7 }
 0x172   : > { %694 = vst [vmem:[%s620_s29 + $0x70] sm:$0xff] %v693_v8 }
 0x173   : > { %696 = vst [vmem:[%s620_s29 + $0x80] sm:$0xff] %v695_v9 }
 0x174   : > { %698 = vst [vmem:[%s620_s29 + $0x90] sm:$0xff] %v697_v10 }
 0x175   : > { %700 = vst [vmem:[%s620_s29 + $0xa0] sm:$0xff] %v699_v11 }
 0x176   : > { %702 = vst [vmem:[%s620_s29 + $0xb0] sm:$0xff] %v701_v12 }
 0x177   : > { %704 = vst [vmem:[%s620_s29 + $0xc0] sm:$0xff] %v703_v13 }
 0x178   : > { %706 = vst [vmem:[%s620_s29 + $0xd0] sm:$0xff] %v705_v14 }
 0x179   : > { %708 = vst [vmem:[%s620_s29 + $0xe0] sm:$0xff] %v707_v15 }
 0x17a   : > { %710 = vst [vmem:[%s620_s29 + $0xf0] sm:$0xff] %v709_v16 }
 0x17b PF: > { %s20_s26 = sadd.s32 1, %s1255_s26   ;;  %s1718_s0 = sld [smem:[#allocation19_spill]] }
 0x17c   : > { %p1615_p12 = scmp.ge.s32.totalorder %s20_s26, 10   ;;  %s1719_s22 = sld [smem:[#allocation15_spill]] }
 0x17d   : > { %s1720_s5 = sld [smem:[#allocation16_spill]]  ;;  %s1723_s12 = smov %s1203_s13 }
 0x17e   : > { %s1721_s4 = sld [smem:[#allocation17_spill]]  ;;  %s1724_s13 = smov %s1468_s20 }
 0x17f   : > { %s1722_s25 = sld [smem:[#allocation18_spill]]  ;;  %s1725_s14 = smov %s1211_s15 }
 0x180   : > { %s1726_s15 = smov %s1215_s16  ;;  %s1728_s17 = smov %s1223_s18 }
 0x181   : > { %s1727_s16 = smov %s1718_s0  ;;  %s1729_s18 = smov %s1227_s19 }
 0x182   : > { %s1730_s19 = smov %s1465_s3  ;;  %s1731_s20 = smov %s1243_s23 }
 0x183   : > { %s1732_s21 = smov %s1247_s24  ;;  %s1733_s23 = smov %s1720_s5 }
 0x184   : > { %s1734_s24 = smov %s1721_s4  ;;  %19 = sbr.rel (!%p1615_p12) target bundleno = 15 (0xf), region = 177 }
 0x189   :  { %733 = vsyncpa [#allocation4], 1 }
 0x18a   :  { %735 = vsyncpa [#allocation4 + $0x1], 1 }
 0x18b   :  { %736 = vsyncpa [#allocation6], 1 }
 0x18c   :  { %738 = vsyncpa [#allocation6 + $0x1], 1 }

</bundles_post_ra>
